<compile_context>
chip_gen: v6e
topology: v6e:2x2x1
jax: 0.10.0
libtpu: 0.0.40
codegen_flags: <defaults>
</compile_context>

<pallas_src>
import functools
import math

import jax
import jax.numpy as jnp
import numpy as np
from jax.experimental import pallas as pl
from jax.experimental.pallas import tpu as pltpu


def _round_up(v, m):
    return (v + m - 1) // m * m


@functools.lru_cache(maxsize=32)
def _dft_bases(T):
    """Combined real-DFT bases, zero-padded to 128-lane multiples (numpy, cached).

    forward  BF [Tp, 2Fp]:  [:, :F]       =  cos(2*pi*k*n/T)
                            [:, Fp:Fp+F]  = -sin(2*pi*k*n/T)    (x @ BF = [Re | Im])
    inverse  BI [2Fp, Tp]:  [:F, :T]      =  w_k*cos(2*pi*k*n/T)
                            [Fp:Fp+F, :T] = -w_k*sin(2*pi*k*n/T)
    with Hermitian weights w_k = 1/T for DC & Nyquist, 2/T otherwise, so that
    [Re | Im] @ BI == irfft reconstruction.
    """
    F = T // 2 + 1
    Tp = _round_up(T, 128)
    Fp = _round_up(F, 128)
    n = np.arange(T, dtype=np.float64)[:, None]            # (T, 1)
    k = np.arange(F, dtype=np.float64)[None, :]            # (1, F)
    ang = (2.0 * np.pi / T) * n * k                        # (T, F)
    cos, sin = np.cos(ang), np.sin(ang)

    bf = np.zeros((Tp, 2 * Fp), np.float32)
    bf[:T, :F] = cos
    bf[:T, Fp:Fp + F] = -sin

    w = np.full((F, 1), 2.0 / T)
    w[0, 0] = 1.0 / T
    if T % 2 == 0:
        w[F - 1, 0] = 1.0 / T
    bi = np.zeros((2 * Fp, Tp), np.float32)
    bi[:F, :T] = w * cos.T
    bi[Fp:Fp + F, :T] = -(w * sin.T)
    return jnp.asarray(bf), jnp.asarray(bi), Tp, Fp


# ------------------------------ Pallas kernels ------------------------------ #

def _dft_fwd_kernel(x_ref, bf_ref, z_ref, kth_ref, *, top_k, n_freq, n_rows,
                    row_tile, zero_first_row):
    """Pass 1: forward real DFT + per-tile k-th-largest |X|^2 partial."""
    x = x_ref[...]                                                    # (TB, Tp)
    z = jnp.dot(x, bf_ref[...], preferred_element_type=jnp.float32)  # (TB, 2Fp)
    z_ref[...] = z

    fp = bf_ref.shape[1] // 2
    xr, xi = z[:, :fp], z[:, fp:]
    sq = xr * xr + xi * xi                                            # |X|^2

    col = jax.lax.broadcasted_iota(jnp.int32, (1, fp), 1)             # (1, Fp)
    row = (jax.lax.broadcasted_iota(jnp.int32, (row_tile, 1), 0)
           + pl.program_id(0) * row_tile)                             # global rows
    valid = col < n_freq
    sq = jnp.where(valid, sq, -1.0)            # padded freq bins never in top-k
    if zero_first_row:
        # torch `freq[0] = 0` on a 2-D input zeroes the whole first row.
        sq = jnp.where(row == 0, jnp.where(valid, 0.0, -1.0), sq)
    else:
        # 1-D input: `freq[0] = 0` zeroes the DC bin.
        sq = jnp.where(col == 0, 0.0, sq)

    # k-th largest per row: knock out exactly ONE occurrence per step (matches
    # torch.topk's duplicate handling; do not knock out all ties).
    work = sq
    kth = sq[:, :1]
    for _ in range(top_k):
        kth = jnp.max(work, axis=-1, keepdims=True)                   # (TB, 1)
        first = jnp.min(jnp.where(work == kth, col, fp),
                        axis=-1, keepdims=True)                       # first argmax
        work = jnp.where(col == first, -jnp.inf, work)

    # Padded batch rows must not influence the global threshold.
    kth = jnp.where(row < n_rows, kth, jnp.inf)
    tile_min = jnp.min(kth, axis=0, keepdims=True)                    # (1, 1)
    kth_ref[...] = jnp.broadcast_to(tile_min, kth_ref.shape)          # lane-dense


def _dft_inv_kernel(thr_ref, x_ref, z_ref, bi_ref, season_ref, trend_ref, *,
                    row_tile, zero_first_row):
    """Pass 2: global-threshold mask + inverse real DFT + trend."""
    thr = thr_ref[0, 0]                                               # SMEM scalar
    z = z_ref[...]                                                    # (TB, 2Fp)
    fp = z.shape[-1] // 2
    xr, xi = z[:, :fp], z[:, fp:]
    sq = xr * xr + xi * xi

    if zero_first_row:
        row = (jax.lax.broadcasted_iota(jnp.int32, (row_tile, 1), 0)
               + pl.program_id(0) * row_tile)
        sq = jnp.where(row == 0, 0.0, sq)
    else:
        col = jax.lax.broadcasted_iota(jnp.int32, (1, fp), 1)
        sq = jnp.where(col == 0, 0.0, sq)

    # torch: xf[freq <= thr] = 0  ->  keep only bins with |X|^2 > thr.
    keep = jnp.where(sq > thr, 1.0, 0.0).astype(z.dtype)              # (TB, Fp)
    zm = z * jnp.tile(keep, (1, 2))                                   # mask Re & Im

    season = jnp.dot(zm, bi_ref[...], preferred_element_type=jnp.float32)
    season_ref[...] = season.astype(season_ref.dtype)
    trend_ref[...] = (x_ref[...] - season).astype(trend_ref.dtype)


# ------------------------------ module wrapper ------------------------------ #

def _compiler_params(block_bytes):
    need = 2 * block_bytes + (2 << 20)               # double-buffered blocks + slack
    limit = int(min(max(need, 32 << 20), 64 << 20))  # stay under v7x 64 MiB VMEM
    return pltpu.CompilerParams(dimension_semantics=("parallel",),
                                vmem_limit_bytes=limit)


@functools.partial(jax.jit, static_argnames=("top_k", "row_tile"))
def dft_series_decomp(x, top_k=5, row_tile=256):
    """Pallas TPU forward of DFT_series_decomp.

    x: [T] or [B, T] (T even, matching torch.fft.irfft's default output length).
    Returns (x_season, x_trend) with the same shape/dtype as x and the exact
    semantics of the PyTorch module for that input shape.
    (On v5e, row_tile=128 matches the 4x128x128 MXU better.)
    """
    squeeze = (x.ndim == 1)
    xb = x[None, :] if squeeze else x
    if xb.ndim != 2:
        raise ValueError("expected a 1-D or 2-D input")
    B, T = xb.shape
    if T % 2 != 0:
        raise ValueError("T must be even (torch.fft.irfft default output length)")
    F = T // 2 + 1
    if not (1 <= top_k <= F):
        raise ValueError("top_k out of range")

    bf, bi, Tp, Fp = _dft_bases(T)
    F2 = 2 * Fp

    # Batch tiling: MXU-friendly row tiles; small batches -> one 8-aligned tile.
    tb = row_tile if B >= row_tile else _round_up(B, 8)
    Bp = _round_up(B, tb)
    n_tiles = Bp // tb

    xpad = jnp.zeros((Bp, Tp), jnp.float32).at[:B, :T].set(xb.astype(jnp.float32))

    # ---- pass 1: forward DFT + per-tile k-th-largest partial ---------------
    fwd = functools.partial(_dft_fwd_kernel, top_k=top_k, n_freq=F, n_rows=B,
                            row_tile=tb, zero_first_row=not squeeze)
    blk1 = 4 * (tb * Tp + Tp * F2 + tb * F2 + 128)
    z, kth = pl.pallas_call(
        fwd,
        grid=(n_tiles,),
        in_specs=[pl.BlockSpec((tb, Tp), lambda i: (i, 0)),            # x tile
                  pl.BlockSpec((Tp, F2), lambda i: (0, 0))],           # fwd basis
        out_specs=(pl.BlockSpec((tb, F2), lambda i: (i, 0)),           # spectrum
                   pl.BlockSpec((1, 128), lambda i: (i, 0))),          # tile partial
        out_shape=(jax.ShapeDtypeStruct((Bp, F2), jnp.float32),
                   jax.ShapeDtypeStruct((n_tiles, 128), jnp.float32)),
        compiler_params=_compiler_params(blk1),
        cost_estimate=pl.CostEstimate(
            flops=2 * Bp * Tp * F2 + (top_k + 3) * Bp * Fp,
            transcendentals=0,
            bytes_accessed=4 * (Bp * Tp + Tp * F2 + Bp * F2 + n_tiles * 128)),
    )(xpad, bf)

    # Global threshold = min over the per-tile k-th-largest partials (tiny op).
    thr = jnp.min(kth).reshape(1, 1)

    # ---- pass 2: mask + inverse DFT + trend ---------------------------------
    inv = functools.partial(_dft_inv_kernel, row_tile=tb,
                            zero_first_row=not squeeze)
    blk2 = 4 * (1 + tb * Tp + tb * F2 + F2 * Tp + 2 * tb * Tp)
    season, trend = pl.pallas_call(
        inv,
        grid=(n_tiles,),
        in_specs=[pl.BlockSpec(memory_space=pltpu.MemorySpace.SMEM),   # thr (1,1)
                  pl.BlockSpec((tb, Tp), lambda i: (i, 0)),            # x tile
                  pl.BlockSpec((tb, F2), lambda i: (i, 0)),            # spectrum
                  pl.BlockSpec((F2, Tp), lambda i: (0, 0))],           # inv basis
        out_specs=(pl.BlockSpec((tb, Tp), lambda i: (i, 0)),
                   pl.BlockSpec((tb, Tp), lambda i: (i, 0))),
        out_shape=(jax.ShapeDtypeStruct((Bp, Tp), jnp.float32),
                   jax.ShapeDtypeStruct((Bp, Tp), jnp.float32)),
        compiler_params=_compiler_params(blk2),
        cost_estimate=pl.CostEstimate(
            flops=2 * Bp * F2 * Tp + 6 * Bp * Fp,
            transcendentals=0,
            bytes_accessed=4 * (3 * Bp * Tp + Bp * F2 + F2 * Tp + 1)),
    )(thr, xpad, z, bi)

    season = season[:B, :T].astype(x.dtype)
    trend = trend[:B, :T].astype(x.dtype)
    if squeeze:
        return season[0], trend[0]
    return season, trend


# -------------------------------- reference --------------------------------- #

def dft_series_decomp_ref(x, top_k=5):
    """Pure-JAX replica of the PyTorch module (uses jnp.fft)."""
    xf = jnp.fft.rfft(x)
    freq = jnp.abs(xf)
    freq = freq.at[0].set(0.0)                       # torch: freq[0] = 0
    top_vals, _ = jax.lax.top_k(freq, top_k)         # top-k along last dim
    thr = jnp.min(top_vals)
    xf = jnp.where(freq <= thr, jnp.zeros_like(xf), xf)
    x_season = jnp.fft.irfft(xf)                     # default n = 2*(F-1)
    x_trend = x - x_season
    return x_season, x_trend


# ----------------------------------- main ------------------------------------ #

if __name__ == "__main__":
    key = jax.random.PRNGKey(0)
    k1, k2, k3 = jax.random.split(key, 3)

    # Case 1: 1-D series with a well-separated top-5 spectrum (the meaningful
    # use: DC zeroed, the top-k frequency bins kept as the seasonal part).
    T = 64
    t = jnp.arange(T, dtype=jnp.float32)
    x1 = (0.3 * jax.random.normal(k1, (T,), jnp.float32)
          + 4.0 * jnp.sin(2 * math.pi * 3 * t / T)
          + 3.0 * jnp.cos(2 * math.pi * 7 * t / T)
          + 2.5 * jnp.sin(2 * math.pi * 11 * t / T)
          + 2.0 * jnp.cos(2 * math.pi * 17 * t / T)
          + 1.5 * jnp.sin(2 * math.pi * 23 * t / T))
    s1, tr1 = jax.block_until_ready(dft_series_decomp(x1, top_k=5))
    rs1, rt1 = dft_series_decomp_ref(x1, top_k=5)
    assert s1.shape == (T,) and tr1.shape == (T,)
    assert jnp.allclose(s1, rs1, atol=2e-3, rtol=2e-3), float(jnp.max(jnp.abs(s1 - rs1)))
    assert jnp.allclose(tr1, rt1, atol=2e-3, rtol=2e-3), float(jnp.max(jnp.abs(tr1 - rt1)))

    # Case 2: small batched 2-D input (single 8-row batch tile), computed
    # exactly as the torch module would (incl. its `freq[0] = 0` first-row
    # behaviour and global threshold).
    B2, T2 = 4, 32
    x2 = jax.random.normal(k2, (B2, T2), jnp.float32)
    s2, tr2 = jax.block_until_ready(dft_series_decomp(x2, top_k=5))
    rs2, rt2 = dft_series_decomp_ref(x2, top_k=5)
    assert s2.shape == (B2, T2) and tr2.shape == (B2, T2)
    assert jnp.allclose(s2, rs2, atol=2e-3, rtol=2e-3), float(jnp.max(jnp.abs(s2 - rs2)))
    assert jnp.allclose(tr2, rt2, atol=2e-3, rtol=2e-3), float(jnp.max(jnp.abs(tr2 - rt2)))

    # Case 3: batch big enough for multiple 256-row grid tiles -> exercises the
    # two-pass global threshold across tiles and the 'parallel' batch grid.
    B3, T3 = 260, 96
    x3 = jax.random.normal(k3, (B3, T3), jnp.float32)
    s3, tr3 = jax.block_until_ready(dft_series_decomp(x3, top_k=5))
    rs3, rt3 = dft_series_decomp_ref(x3, top_k=5)
    assert s3.shape == (B3, T3) and tr3.shape == (B3, T3)
    assert jnp.allclose(s3, rs3, atol=5e-3, rtol=5e-3), float(jnp.max(jnp.abs(s3 - rs3)))
    assert jnp.allclose(tr3, rt3, atol=5e-3, rtol=5e-3), float(jnp.max(jnp.abs(tr3 - rt3)))

    print("KERNEL_OK")
</pallas_src>

<mosaic_0001>
module attributes {stable_mosaic.version = 11 : i64} {
  func.func @_dft_inv_kernel(%arg0: i32, %arg1: memref<1x1xf32, #tpu.memory_space<smem>>, %arg2: memref<8x128xf32, #tpu.memory_space<vmem>>, %arg3: memref<8x256xf32, #tpu.memory_space<vmem>>, %arg4: memref<256x128xf32, #tpu.memory_space<vmem>>, %arg5: memref<8x128xf32, #tpu.memory_space<vmem>>, %arg6: memref<8x128xf32, #tpu.memory_space<vmem>>) attributes {dimension_semantics = [#tpu.dimension_semantics<parallel>], iteration_bounds = array<i64: 1>, scalar_prefetch = 0 : i64, scratch_operands = 0 : i64, tpu.core_type = #tpu.core_type<tc>, window_params = [{transform_indices = @transform_0, window_bounds = array<i64: 1, 1>}, {transform_indices = @transform_1, window_bounds = array<i64: 8, 128>}, {transform_indices = @transform_2, window_bounds = array<i64: 8, 256>}, {pipeline_mode = #tpu.pipeline_mode<synchronous>, transform_indices = @transform_3, window_bounds = array<i64: 256, 128>}, {transform_indices = @transform_4, window_bounds = array<i64: 8, 128>}, {transform_indices = @transform_5, window_bounds = array<i64: 8, 128>}]} {
    %c0 = arith.constant 0 : index
    %c0_0 = arith.constant 0 : index
    %0 = memref.load %arg1[%c0, %c0_0] : memref<1x1xf32, #tpu.memory_space<smem>>
    %c0_1 = arith.constant 0 : index
    %c0_2 = arith.constant 0 : index
    %1 = vector.load %arg3[%c0_1, %c0_2] : memref<8x256xf32, #tpu.memory_space<vmem>>, vector<8x256xf32>
    %2 = vector.extract_strided_slice %1 {offsets = [0, 0], sizes = [8, 128], strides = [1, 1]} : vector<8x256xf32> to vector<8x128xf32>
    %3 = vector.extract_strided_slice %1 {offsets = [0, 128], sizes = [8, 128], strides = [1, 1]} : vector<8x256xf32> to vector<8x128xf32>
    %4 = arith.mulf %2, %2 : vector<8x128xf32>
    %5 = arith.mulf %3, %3 : vector<8x128xf32>
    %6 = arith.addf %4, %5 : vector<8x128xf32>
    %7 = tpu.iota {dimensions = array<i32: 1>} : vector<1x128xi32>
    %c0_i32 = arith.constant 0 : i32
    %8 = vector.broadcast %c0_i32 : i32 to vector<1x128xi32>
    %9 = arith.cmpi eq, %7, %8 : vector<1x128xi32>
    %cst = arith.constant 0.000000e+00 : f32
    %10 = vector.shape_cast %9 : vector<1x128xi1> to vector<1x128xi1>
    %11 = vector.broadcast %10 : vector<1x128xi1> to vector<8x128xi1>
    %12 = vector.broadcast %cst : f32 to vector<8x128xf32>
    %13 = arith.select %11, %12, %6 : vector<8x128xi1>, vector<8x128xf32>
    %14 = vector.broadcast %0 : f32 to vector<8x128xf32>
    %15 = arith.cmpf ogt, %13, %14 : vector<8x128xf32>
    %cst_3 = arith.constant 1.000000e+00 : f32
    %cst_4 = arith.constant 0.000000e+00 : f32
    %16 = vector.broadcast %cst_3 : f32 to vector<8x128xf32>
    %17 = vector.broadcast %cst_4 : f32 to vector<8x128xf32>
    %18 = arith.select %15, %16, %17 : vector<8x128xi1>, vector<8x128xf32>
    %19 = tpu.concatenate %18, %18 in 1 : vector<8x128xf32>, vector<8x128xf32> -> vector<8x256xf32>
    %20 = arith.mulf %1, %19 : vector<8x256xf32>
    %c0_5 = arith.constant 0 : index
    %c0_6 = arith.constant 0 : index
    %21 = vector.load %arg4[%c0_5, %c0_6] : memref<256x128xf32, #tpu.memory_space<vmem>>, vector<256x128xf32>
    %cst_7 = arith.constant dense<0.000000e+00> : vector<8x128xf32>
    %22 = tpu.matmul %20, %21, %cst_7 {dimension_numbers = #tpu.dot_dimension_numbers<[1], [0], [0], [1], [0, 0, 1, 1], [], []>} : vector<8x256xf32>, vector<256x128xf32>, vector<8x128xf32> -> vector<8x128xf32>
    %c0_8 = arith.constant 0 : index
    %c0_9 = arith.constant 0 : index
    %23 = vector.load %arg5[%c0_8, %c0_9] : memref<8x128xf32, #tpu.memory_space<vmem>>, vector<8x128xf32>
    tpu.vector_store %arg5[%c0_8, %c0_9], %22 {strides = array<i32>} : memref<8x128xf32, #tpu.memory_space<vmem>>, vector<8x128xf32>,
    %c0_10 = arith.constant 0 : index
    %c0_11 = arith.constant 0 : index
    %24 = vector.load %arg2[%c0_10, %c0_11] : memref<8x128xf32, #tpu.memory_space<vmem>>, vector<8x128xf32>
    %25 = arith.subf %24, %22 : vector<8x128xf32>
    %c0_12 = arith.constant 0 : index
    %c0_13 = arith.constant 0 : index
    %26 = vector.load %arg6[%c0_12, %c0_13] : memref<8x128xf32, #tpu.memory_space<vmem>>, vector<8x128xf32>
    tpu.vector_store %arg6[%c0_12, %c0_13], %25 {strides = array<i32>} : memref<8x128xf32, #tpu.memory_space<vmem>>, vector<8x128xf32>,
    return
  }
  func.func @transform_0(%arg0: i32) -> (i32, i32) {
    %c0_i32 = arith.constant 0 : i32
    %c0_i32_0 = arith.constant 0 : i32
    %c0_i32_1 = arith.constant 0 : i32
    return %c0_i32, %c0_i32_0 : i32, i32
  }
  func.func @transform_1(%arg0: i32) -> (i32, i32) {
    %c0_i32 = arith.constant 0 : i32
    %c0_i32_0 = arith.constant 0 : i32
    return %arg0, %c0_i32 : i32, i32
  }
  func.func @transform_2(%arg0: i32) -> (i32, i32) {
    %c0_i32 = arith.constant 0 : i32
    %c0_i32_0 = arith.constant 0 : i32
    return %arg0, %c0_i32 : i32, i32
  }
  func.func @transform_3(%arg0: i32) -> (i32, i32) {
    %c0_i32 = arith.constant 0 : i32
    %c0_i32_0 = arith.constant 0 : i32
    %c0_i32_1 = arith.constant 0 : i32
    return %c0_i32, %c0_i32_0 : i32, i32
  }
  func.func @transform_4(%arg0: i32) -> (i32, i32) {
    %c0_i32 = arith.constant 0 : i32
    %c0_i32_0 = arith.constant 0 : i32
    return %arg0, %c0_i32 : i32, i32
  }
  func.func @transform_5(%arg0: i32) -> (i32, i32) {
    %c0_i32 = arith.constant 0 : i32
    %c0_i32_0 = arith.constant 0 : i32
    return %arg0, %c0_i32 : i32, i32
  }
}

module attributes {stable_mosaic.version = 11 : i64} {
  func.func @_dft_fwd_kernel(%arg0: i32, %arg1: memref<8x128xf32, #tpu.memory_space<vmem>>, %arg2: memref<128x256xf32, #tpu.memory_space<vmem>>, %arg3: memref<8x256xf32, #tpu.memory_space<vmem>>, %arg4: memref<1x128xf32, #tpu.memory_space<vmem>>) attributes {dimension_semantics = [#tpu.dimension_semantics<parallel>], iteration_bounds = array<i64: 1>, scalar_prefetch = 0 : i64, scratch_operands = 0 : i64, tpu.core_type = #tpu.core_type<tc>, window_params = [{transform_indices = @transform_0, window_bounds = array<i64: 8, 128>}, {pipeline_mode = #tpu.pipeline_mode<synchronous>, transform_indices = @transform_1, window_bounds = array<i64: 128, 256>}, {transform_indices = @transform_2, window_bounds = array<i64: 8, 256>}, {transform_indices = @transform_3, window_bounds = array<i64: 1, 128>}]} {
    %c0 = arith.constant 0 : index
    %c0_0 = arith.constant 0 : index
    %0 = vector.load %arg1[%c0, %c0_0] : memref<8x128xf32, #tpu.memory_space<vmem>>, vector<8x128xf32>
    %c0_1 = arith.constant 0 : index
    %c0_2 = arith.constant 0 : index
    %1 = vector.load %arg2[%c0_1, %c0_2] : memref<128x256xf32, #tpu.memory_space<vmem>>, vector<128x256xf32>
    %cst = arith.constant dense<0.000000e+00> : vector<8x256xf32>
    %2 = tpu.matmul %0, %1, %cst {dimension_numbers = #tpu.dot_dimension_numbers<[1], [0], [0], [1], [0, 0, 1, 1], [], []>} : vector<8x128xf32>, vector<128x256xf32>, vector<8x256xf32> -> vector<8x256xf32>
    %c0_3 = arith.constant 0 : index
    %c0_4 = arith.constant 0 : index
    %3 = vector.load %arg3[%c0_3, %c0_4] : memref<8x256xf32, #tpu.memory_space<vmem>>, vector<8x256xf32>
    tpu.vector_store %arg3[%c0_3, %c0_4], %2 {strides = array<i32>} : memref<8x256xf32, #tpu.memory_space<vmem>>, vector<8x256xf32>,
    %4 = vector.extract_strided_slice %2 {offsets = [0, 0], sizes = [8, 128], strides = [1, 1]} : vector<8x256xf32> to vector<8x128xf32>
    %5 = vector.extract_strided_slice %2 {offsets = [0, 128], sizes = [8, 128], strides = [1, 1]} : vector<8x256xf32> to vector<8x128xf32>
    %6 = arith.mulf %4, %4 : vector<8x128xf32>
    %7 = arith.mulf %5, %5 : vector<8x128xf32>
    %8 = arith.addf %6, %7 : vector<8x128xf32>
    %9 = tpu.iota {dimensions = array<i32: 1>} : vector<1x128xi32>
    %10 = tpu.iota {dimensions = array<i32: 0>} : vector<8x1xi32>
    %c8_i32 = arith.constant 8 : i32
    %11 = arith.muli %arg0, %c8_i32 : i32
    %12 = vector.broadcast %11 : i32 to vector<8x1xi32>
    %13 = arith.addi %10, %12 : vector<8x1xi32>
    %c33_i32 = arith.constant 33 : i32
    %14 = vector.broadcast %c33_i32 : i32 to vector<1x128xi32>
    %15 = arith.cmpi slt, %9, %14 : vector<1x128xi32>
    %cst_5 = arith.constant -1.000000e+00 : f32
    %16 = vector.shape_cast %15 : vector<1x128xi1> to vector<1x128xi1>
    %17 = vector.broadcast %16 : vector<1x128xi1> to vector<8x128xi1>
    %18 = vector.broadcast %cst_5 : f32 to vector<8x128xf32>
    %19 = arith.select %17, %8, %18 : vector<8x128xi1>, vector<8x128xf32>
    %c0_i32 = arith.constant 0 : i32
    %20 = vector.broadcast %c0_i32 : i32 to vector<1x128xi32>
    %21 = arith.cmpi eq, %9, %20 : vector<1x128xi32>
    %cst_6 = arith.constant 0.000000e+00 : f32
    %22 = vector.shape_cast %21 : vector<1x128xi1> to vector<1x128xi1>
    %23 = vector.broadcast %22 : vector<1x128xi1> to vector<8x128xi1>
    %24 = vector.broadcast %cst_6 : f32 to vector<8x128xf32>
    %25 = arith.select %23, %24, %19 : vector<8x128xi1>, vector<8x128xf32>
    %cst_7 = arith.constant dense<0xFF800000> : vector<8xf32>
    %26 = vector.multi_reduction <maximumf>, %25, %cst_7 [1] : vector<8x128xf32> to vector<8xf32>
    %27 = vector.shape_cast %26 : vector<8xf32> to vector<8x1xf32>
    %28 = vector.broadcast %27 : vector<8x1xf32> to vector<8x128xf32>
    %29 = arith.cmpf oeq, %25, %28 : vector<8x128xf32>
    %c128_i32 = arith.constant 128 : i32
    %30 = vector.shape_cast %9 : vector<1x128xi32> to vector<1x128xi32>
    %31 = vector.broadcast %30 : vector<1x128xi32> to vector<8x128xi32>
    %32 = vector.broadcast %c128_i32 : i32 to vector<8x128xi32>
    %33 = arith.select %29, %31, %32 : vector<8x128xi1>, vector<8x128xi32>
    %cst_8 = arith.constant dense<2147483647> : vector<8xi32>
    %34 = vector.multi_reduction <minsi>, %33, %cst_8 [1] : vector<8x128xi32> to vector<8xi32>
    %35 = vector.shape_cast %34 : vector<8xi32> to vector<8x1xi32>
    %36 = vector.broadcast %9 : vector<1x128xi32> to vector<8x128xi32>
    %37 = vector.broadcast %35 : vector<8x1xi32> to vector<8x128xi32>
    %38 = arith.cmpi eq, %36, %37 : vector<8x128xi32>
    %cst_9 = arith.constant 0xFF800000 : f32
    %39 = vector.broadcast %cst_9 : f32 to vector<8x128xf32>
    %40 = arith.select %38, %39, %25 : vector<8x128xi1>, vector<8x128xf32>
    %cst_10 = arith.constant dense<0xFF800000> : vector<8xf32>
    %41 = vector.multi_reduction <maximumf>, %40, %cst_10 [1] : vector<8x128xf32> to vector<8xf32>
    %42 = vector.shape_cast %41 : vector<8xf32> to vector<8x1xf32>
    %43 = vector.broadcast %42 : vector<8x1xf32> to vector<8x128xf32>
    %44 = arith.cmpf oeq, %40, %43 : vector<8x128xf32>
    %c128_i32_11 = arith.constant 128 : i32
    %45 = vector.shape_cast %9 : vector<1x128xi32> to vector<1x128xi32>
    %46 = vector.broadcast %45 : vector<1x128xi32> to vector<8x128xi32>
    %47 = vector.broadcast %c128_i32_11 : i32 to vector<8x128xi32>
    %48 = arith.select %44, %46, %47 : vector<8x128xi1>, vector<8x128xi32>
    %cst_12 = arith.constant dense<2147483647> : vector<8xi32>
    %49 = vector.multi_reduction <minsi>, %48, %cst_12 [1] : vector<8x128xi32> to vector<8xi32>
    %50 = vector.shape_cast %49 : vector<8xi32> to vector<8x1xi32>
    %51 = vector.broadcast %9 : vector<1x128xi32> to vector<8x128xi32>
    %52 = vector.broadcast %50 : vector<8x1xi32> to vector<8x128xi32>
    %53 = arith.cmpi eq, %51, %52 : vector<8x128xi32>
    %cst_13 = arith.constant 0xFF800000 : f32
    %54 = vector.broadcast %cst_13 : f32 to vector<8x128xf32>
    %55 = arith.select %53, %54, %40 : vector<8x128xi1>, vector<8x128xf32>
    %cst_14 = arith.constant dense<0xFF800000> : vector<8xf32>
    %56 = vector.multi_reduction <maximumf>, %55, %cst_14 [1] : vector<8x128xf32> to vector<8xf32>
    %57 = vector.shape_cast %56 : vector<8xf32> to vector<8x1xf32>
    %58 = vector.broadcast %57 : vector<8x1xf32> to vector<8x128xf32>
    %59 = arith.cmpf oeq, %55, %58 : vector<8x128xf32>
    %c128_i32_15 = arith.constant 128 : i32
    %60 = vector.shape_cast %9 : vector<1x128xi32> to vector<1x128xi32>
    %61 = vector.broadcast %60 : vector<1x128xi32> to vector<8x128xi32>
    %62 = vector.broadcast %c128_i32_15 : i32 to vector<8x128xi32>
    %63 = arith.select %59, %61, %62 : vector<8x128xi1>, vector<8x128xi32>
    %cst_16 = arith.constant dense<2147483647> : vector<8xi32>
    %64 = vector.multi_reduction <minsi>, %63, %cst_16 [1] : vector<8x128xi32> to vector<8xi32>
    %65 = vector.shape_cast %64 : vector<8xi32> to vector<8x1xi32>
    %66 = vector.broadcast %9 : vector<1x128xi32> to vector<8x128xi32>
    %67 = vector.broadcast %65 : vector<8x1xi32> to vector<8x128xi32>
    %68 = arith.cmpi eq, %66, %67 : vector<8x128xi32>
    %cst_17 = arith.constant 0xFF800000 : f32
    %69 = vector.broadcast %cst_17 : f32 to vector<8x128xf32>
    %70 = arith.select %68, %69, %55 : vector<8x128xi1>, vector<8x128xf32>
    %cst_18 = arith.constant dense<0xFF800000> : vector<8xf32>
    %71 = vector.multi_reduction <maximumf>, %70, %cst_18 [1] : vector<8x128xf32> to vector<8xf32>
    %72 = vector.shape_cast %71 : vector<8xf32> to vector<8x1xf32>
    %73 = vector.broadcast %72 : vector<8x1xf32> to vector<8x128xf32>
    %74 = arith.cmpf oeq, %70, %73 : vector<8x128xf32>
    %c128_i32_19 = arith.constant 128 : i32
    %75 = vector.shape_cast %9 : vector<1x128xi32> to vector<1x128xi32>
    %76 = vector.broadcast %75 : vector<1x128xi32> to vector<8x128xi32>
    %77 = vector.broadcast %c128_i32_19 : i32 to vector<8x128xi32>
    %78 = arith.select %74, %76, %77 : vector<8x128xi1>, vector<8x128xi32>
    %cst_20 = arith.constant dense<2147483647> : vector<8xi32>
    %79 = vector.multi_reduction <minsi>, %78, %cst_20 [1] : vector<8x128xi32> to vector<8xi32>
    %80 = vector.shape_cast %79 : vector<8xi32> to vector<8x1xi32>
    %81 = vector.broadcast %9 : vector<1x128xi32> to vector<8x128xi32>
    %82 = vector.broadcast %80 : vector<8x1xi32> to vector<8x128xi32>
    %83 = arith.cmpi eq, %81, %82 : vector<8x128xi32>
    %cst_21 = arith.constant 0xFF800000 : f32
    %84 = vector.broadcast %cst_21 : f32 to vector<8x128xf32>
    %85 = arith.select %83, %84, %70 : vector<8x128xi1>, vector<8x128xf32>
    %cst_22 = arith.constant dense<0xFF800000> : vector<8xf32>
    %86 = vector.multi_reduction <maximumf>, %85, %cst_22 [1] : vector<8x128xf32> to vector<8xf32>
    %87 = vector.shape_cast %86 : vector<8xf32> to vector<8x1xf32>
    %c1_i32 = arith.constant 1 : i32
    %88 = vector.broadcast %c1_i32 : i32 to vector<8x1xi32>
    %89 = arith.cmpi slt, %13, %88 : vector<8x1xi32>
    %cst_23 = arith.constant 0x7F800000 : f32
    %90 = vector.broadcast %cst_23 : f32 to vector<8x1xf32>
    %91 = arith.select %89, %87, %90 : vector<8x1xi1>, vector<8x1xf32>
    %cst_24 = arith.constant dense<0x7F800000> : vector<1xf32>
    %92 = vector.multi_reduction <minimumf>, %91, %cst_24 [0] : vector<8x1xf32> to vector<1xf32>
    %93 = vector.shape_cast %92 : vector<1xf32> to vector<1x1xf32>
    %94 = vector.shape_cast %93 : vector<1x1xf32> to vector<1x1xf32>
    %95 = vector.broadcast %94 : vector<1x1xf32> to vector<1x128xf32>
    %c0_25 = arith.constant 0 : index
    %c0_26 = arith.constant 0 : index
    %96 = vector.load %arg4[%c0_25, %c0_26] : memref<1x128xf32, #tpu.memory_space<vmem>>, vector<1x128xf32>
    tpu.vector_store %arg4[%c0_25, %c0_26], %95 {strides = array<i32>} : memref<1x128xf32, #tpu.memory_space<vmem>>, vector<1x128xf32>,
    return
  }
  func.func @transform_0(%arg0: i32) -> (i32, i32) {
    %c0_i32 = arith.constant 0 : i32
    %c0_i32_0 = arith.constant 0 : i32
    return %arg0, %c0_i32 : i32, i32
  }
  func.func @transform_1(%arg0: i32) -> (i32, i32) {
    %c0_i32 = arith.constant 0 : i32
    %c0_i32_0 = arith.constant 0 : i32
    %c0_i32_1 = arith.constant 0 : i32
    return %c0_i32, %c0_i32_0 : i32, i32
  }
  func.func @transform_2(%arg0: i32) -> (i32, i32) {
    %c0_i32 = arith.constant 0 : i32
    %c0_i32_0 = arith.constant 0 : i32
    return %arg0, %c0_i32 : i32, i32
  }
  func.func @transform_3(%arg0: i32) -> (i32, i32) {
    %c0_i32 = arith.constant 0 : i32
    %c0_i32_0 = arith.constant 0 : i32
    return %arg0, %c0_i32 : i32, i32
  }
}

</mosaic_0001>

<bundles_post_ra>
// kernel: dft_series_decomp.3
= control target key start
LH: loop header
LB: loop body
LE: loop exit
PB: predicated region body
PF: predicated region fallthrough
CT: control target
= control target key end

     0   :  { %v26_v8 = vlaneseq  ;;  %v187_v30 = vmov 0.0   ;;  %s332_s3 = inlined_call_operand.vmem [shape: f32[256,128], index: 3, kind: input, shape index: {}]   ;;  %s333_s2 = inlined_call_operand.vmem [shape: f32[8,256], index: 2, kind: input, shape index: {}]   ;;  %s334_s0 = inlined_call_operand.<no memory space> [shape: f32[1,1], index: 0, kind: input, shape index: {}]   ;;  %s335_s1 = inlined_call_operand.vmem [shape: f32[8,128], index: 1, kind: input, shape index: {}]   ;;  %s336_s4 = inlined_call_operand.vmem [shape: f32[8,128], index: 4, kind: output, shape index: {0}]   ;;  %s337_s5 = inlined_call_operand.vmem [shape: f32[8,128], index: 5, kind: output, shape index: {1}]  }
   0x1   :  { %v68_v0 = vld [vmem:[%s332_s3 + $0xf8] sm:$0xff]  ;;  %v67_v2 = vld [vmem:[%s332_s3 + $0xf0] sm:$0xff]  ;;  %v66_v4 = vld [vmem:[%s332_s3 + $0xe8] sm:$0xff]  ;;  %v32_v24 = vstv %s334_s0 }
   0x2   :  { %v52_v1 = vld [vmem:[%s332_s3 + $0x78] sm:$0xff]  ;;  %151 = vmatprep.subr.mxu0 %v68_v0  ;;  %v51_v3 = vld [vmem:[%s332_s3 + $0x70] sm:$0xff]  ;;  %v50_v5 = vld [vmem:[%s332_s3 + $0x68] sm:$0xff]  ;;  %v27_v13 = vand.u32 127, %v26_v8 }
   0x3   :  { %152 = vmatpush3.msra.mxu0 %v52_v1  ;;  %v65_v6 = vld [vmem:[%s332_s3 + $0xe0] sm:$0xff]  ;;  %v64_v9 = vld [vmem:[%s332_s3 + $0xd8] sm:$0xff]  ;;  %v63_v11 = vld [vmem:[%s332_s3 + $0xd0] sm:$0xff] }
   0x4   :  { %153 = vmatprep.subr.mxu0 %v67_v2  ;;  %v49_v7 = vld [vmem:[%s332_s3 + $0x60] sm:$0xff]  ;;  %v48_v10 = vld [vmem:[%s332_s3 + $0x58] sm:$0xff]  ;;  %v47_v12 = vld [vmem:[%s332_s3 + $0x50] sm:$0xff]  ;;  %vm28_vm0 = vcmp.eq.s32.totalorder %v27_v13, 0 }
   0x5   :  { %154 = vmatpush3.msra.mxu0 %v51_v3  ;;  %v62_v14 = vld [vmem:[%s332_s3 + $0xc8] sm:$0xff]  ;;  %v21_v15 = vld [vmem:[%s333_s2] sm:$0xff]  ;;  %v60_v22 = vld [vmem:[%s332_s3 + $0xb8] sm:$0xff] }
   0x6   :  { %155 = vmatprep.subr.mxu0 %v66_v4  ;;  %v46_v16 = vld [vmem:[%s332_s3 + $0x48] sm:$0xff]  ;;  %v23_v18 = vmul.f32 %v21_v15, %v21_v15  ;;  %v61_v19 = vld [vmem:[%s332_s3 + $0xc0] sm:$0xff]  ;;  %v44_v25 = vld [vmem:[%s332_s3 + $0x38] sm:$0xff] }
   0x7   :  { %156 = vmatpush3.msra.mxu0 %v50_v5  ;;  %v22_v17 = vld [vmem:[%s333_s2 + $0x8] sm:$0xff]  ;;  %v45_v21 = vld [vmem:[%s332_s3 + $0x40] sm:$0xff]  ;;  %v59_v26 = vld [vmem:[%s332_s3 + $0xb0] sm:$0xff] }
   0x8   :  { %157 = vmatprep.subr.mxu0 %v65_v6  ;;  %v24_v20 = vmul.f32 %v22_v17, %v22_v17  ;;  %v43_v28 = vld [vmem:[%s332_s3 + $0x30] sm:$0xff]  ;;  %v58_v29 = vld [vmem:[%s332_s3 + $0xa8] sm:$0xff]  ;;  %v57_v34 = vld [vmem:[%s332_s3 + $0xa0] sm:$0xff] }
   0x9   :  { %158 = vmatpush3.msra.mxu0 %v49_v7  ;;  %v42_v32 = vld [vmem:[%s332_s3 + $0x28] sm:$0xff]  ;;  %v41_v35 = vld [vmem:[%s332_s3 + $0x20] sm:$0xff]  ;;  %v56_v36 = vld [vmem:[%s332_s3 + $0x98] sm:$0xff] }
   0xa   :  { %159 = vmatprep.subr.mxu0 %v64_v9  ;;  %v25_v23 = vadd.f32 %v24_v20, %v23_v18  ;;  %v40_v37 = vld [vmem:[%s332_s3 + $0x18] sm:$0xff]  ;;  %v55_v38 = vld [vmem:[%s332_s3 + $0x90] sm:$0xff]  ;;  %v54_v40 = vld [vmem:[%s332_s3 + $0x88] sm:$0xff] }
   0xb   :  { %160 = vmatpush3.msra.mxu0 %v48_v10  ;;  %v39_v39 = vld [vmem:[%s332_s3 + $0x10] sm:$0xff]  ;;  %v38_v41 = vld [vmem:[%s332_s3 + $0x8] sm:$0xff]  ;;  %v53_v42 = vld [vmem:[%s332_s3 + $0x80] sm:$0xff] }
   0xc   :  { %161 = vmatprep.subr.mxu0 %v63_v11  ;;  %v31_v27 = vsel %vm28_vm0, 0.0, %v25_v23  ;;  %v37_v43 = vld [vmem:[%s332_s3] sm:$0xff] }
   0xd   :  { %162 = vmatpush3.msra.mxu0 %v47_v12  ;;  %vm33_vm1 = vcmp.gt.f32.partialorder %v31_v27, %v32_v24  ;;  %v140_v47 = vld [vmem:[%s335_s1] sm:$0xff] }
   0xe   :  { %163 = vmatprep.subr.mxu0 %v62_v14  ;;  %v34_v31 = vsel %vm33_vm1, 1.0, %v187_v30 }
   0xf   :  { %164 = vmatpush3.msra.mxu0 %v46_v16  ;;  %v36_v33 = vmul.f32 %v34_v31, %v22_v17  ;;  %v35_v44 = vmul.f32 %v34_v31, %v21_v15 }
  0x10   :  { %165 = vmatprep.subr.mxu0 %v61_v19 }
  0x11   :  { %166 = vmatpush3.msra.mxu0 %v45_v21  ;;  %133 = vmatprep.mubr.f32.mxu0 %v36_v33 }
  0x12   :  { %167 = vmatprep.subr.mxu0 %v60_v22 }
  0x13   :  { %168 = vmatpush3.msra.mxu0 %v44_v25 }
  0x14   :  { %169 = vmatprep.subr.mxu0 %v59_v26 }
  0x15   :  { %170 = vmatpush3.msra.mxu0 %v43_v28 }
  0x16   :  { %171 = vmatprep.subr.mxu0 %v58_v29 }
  0x17   :  { %172 = vmatpush3.msra.mxu0 %v42_v32 }
  0x18   :  { %173 = vmatprep.subr.mxu0 %v57_v34 }
  0x19   :  { %174 = vmatpush3.msra.mxu0 %v41_v35 }
  0x1a   :  { %175 = vmatprep.subr.mxu0 %v56_v36 }
  0x1b   :  { %176 = vmatpush3.msra.mxu0 %v40_v37 }
  0x1c   :  { %177 = vmatprep.subr.mxu0 %v55_v38 }
  0x1d   :  { %178 = vmatpush3.msra.mxu0 %v39_v39 }
  0x1e   :  { %179 = vmatprep.subr.mxu0 %v54_v40 }
  0x1f   :  { %180 = vmatpush3.msra.mxu0 %v38_v41 }
  0x20   :  { %181 = vmatprep.subr.mxu0 %v53_v42 }
  0x21   :  { %182 = vmatpush3.msra.mxu0 %v37_v43 }
  0x22   :  { %134 = vmatmul.mubr.f32.vlgmr.msra.gmra.mxu0 %v35_v44 }
  0xe2   :  { %v183_v45 = vpop.f32.mrf.mxu0 }
  0xe4   :  { %v184_v46 = vpop.f32.mrf.mxu0 }
  0xe5   :  { %v185_v48 = vadd.f32 %v184_v46, %v183_v45 }
  0xe7   :  { %139 = vst [vmem:[%s336_s4] sm:$0xff] %v185_v48  ;;  %v141_v49 = vsub.f32 %v140_v47, %v185_v48 }
  0xe9   :  { %142 = vst [vmem:[%s337_s5] sm:$0xff] %v141_v49 }

// kernel: dft_series_decomp.2
= control target key start
LH: loop header
LB: loop body
LE: loop exit
PB: predicated region body
PF: predicated region fallthrough
CT: control target
= control target key end

     0   :  { %9 = vsyncpa [#allocation3], 0  ;;  %s277_s12 = smov [#allocation2]   ;;  %s330_s0 = inlined_call_operand.vmem [shape: f32[8,128], index: 0, kind: input, shape index: {}]   ;;  %s331_s1 = inlined_call_operand.hbm [shape: f32[128,256], index: 1, kind: input, shape index: {}]   ;;  %s332_s2 = inlined_call_operand.vmem [shape: f32[8,256], index: 2, kind: output, shape index: {0}]   ;;  %s333_s3 = inlined_call_operand.vmem [shape: f32[1,128], index: 3, kind: output, shape index: {1}]  }
   0x1   :  { %s17_s13 = sshll.u32 %s277_s12, 4  ;;  %s18_s13 = int_to_ptr.vmem [resolvable:$true] %s17_s13 }
   0x2   :  { %s263_s14 = scalar_lea.vmem %s18_s13, 4096  ;;  %p268_p1 = scmp.lt.s32.totalorder %s18_s13, %s18_s13 }
   0x3   :  { %p264_p0 = scmp.ne.s32.totalorder %s18_s13, %s263_s14  ;;  %p269_p2 = scmp.lt.s32.totalorder %s263_s14, %s263_s14 }
   0x5   :  { %p270_p3 = por %p269_p2, %p268_p1 }
   0x7   :  { %p271_p4 = pnand %p270_p3, %p264_p0 }
   0x9   :  { %274 = shalt.err (!%p271_p4)
}
   0xa   :  { %s278_s15 = smov 256   ;;  %s279_s16 = smov 16  }
   0xb   :  { %23 = dma.hbm_to_vmem [thread:$0]  %s331_s1, 4096, %s18_s13, [#allocation3], %s278_s15, %s278_s15, %s279_s16  }
   0xc   :  { %275 = dma.done.wait [#allocation3], 4096  }
   0xd   :  { %276 = vsyncadd [#allocation3], 4294963200  ;;  %v280_v0 = vmov 0.0   ;;  %v59_v1 = vld [vmem:[#allocation2 + $0xf8] sm:$0xff]  ;;  %v58_v2 = vld [vmem:[#allocation2 + $0xf0] sm:$0xff]  ;;  %v136_v34 = vlaneseq }
   0xe   :  { %124 = vmatprep.mubr.f32.mxu0 %v280_v0  ;;  %v57_v3 = vld [vmem:[#allocation2 + $0xe8] sm:$0xff]  ;;  %60 = vmatprep.subr.mxu0 %v59_v1  ;;  %v56_v4 = vld [vmem:[#allocation2 + $0xe0] sm:$0xff]  ;;  %v55_v5 = vld [vmem:[#allocation2 + $0xd8] sm:$0xff] }
   0xf   :  { %61 = vmatpush1.msra.mxu0 %v58_v2  ;;  %v54_v6 = vld [vmem:[#allocation2 + $0xd0] sm:$0xff]  ;;  %v53_v7 = vld [vmem:[#allocation2 + $0xc8] sm:$0xff]  ;;  %v52_v8 = vld [vmem:[#allocation2 + $0xc0] sm:$0xff]  ;;  %v308_v36 = vand.u32 127, %v136_v34 }
  0x10   :  { %62 = vmatprep.subr.mxu0 %v57_v3  ;;  %v51_v9 = vld [vmem:[#allocation2 + $0xb8] sm:$0xff]  ;;  %v50_v10 = vld [vmem:[#allocation2 + $0xb0] sm:$0xff]  ;;  %v49_v11 = vld [vmem:[#allocation2 + $0xa8] sm:$0xff] }
  0x11   :  { %63 = vmatpush1.msra.mxu0 %v56_v4  ;;  %v48_v12 = vld [vmem:[#allocation2 + $0xa0] sm:$0xff]  ;;  %v47_v13 = vld [vmem:[#allocation2 + $0x98] sm:$0xff]  ;;  %v46_v14 = vld [vmem:[#allocation2 + $0x90] sm:$0xff]  ;;  %vm143_vm0 = vcmp.lt.s32.totalorder %v308_v36, 33  ;;  %vm147_vm1 = vcmp.eq.s32.totalorder %v308_v36, 0 }
  0x12   :  { %64 = vmatprep.subr.mxu0 %v55_v5  ;;  %v45_v15 = vld [vmem:[#allocation2 + $0x88] sm:$0xff]  ;;  %v44_v16 = vld [vmem:[#allocation2 + $0x80] sm:$0xff]  ;;  %v43_v17 = vld [vmem:[#allocation2 + $0x78] sm:$0xff] }
  0x13   :  { %65 = vmatpush1.msra.mxu0 %v54_v6  ;;  %v42_v18 = vld [vmem:[#allocation2 + $0x70] sm:$0xff]  ;;  %v41_v19 = vld [vmem:[#allocation2 + $0x68] sm:$0xff]  ;;  %v40_v20 = vld [vmem:[#allocation2 + $0x60] sm:$0xff] }
  0x14   :  { %66 = vmatprep.subr.mxu0 %v53_v7  ;;  %v39_v21 = vld [vmem:[#allocation2 + $0x58] sm:$0xff]  ;;  %v38_v22 = vld [vmem:[#allocation2 + $0x50] sm:$0xff]  ;;  %v37_v23 = vld [vmem:[#allocation2 + $0x48] sm:$0xff] }
  0x15   :  { %67 = vmatpush1.msra.mxu0 %v52_v8  ;;  %v36_v24 = vld [vmem:[#allocation2 + $0x40] sm:$0xff]  ;;  %v35_v25 = vld [vmem:[#allocation2 + $0x38] sm:$0xff]  ;;  %v34_v26 = vld [vmem:[#allocation2 + $0x30] sm:$0xff] }
  0x16   :  { %68 = vmatprep.subr.mxu0 %v51_v9  ;;  %v33_v27 = vld [vmem:[#allocation2 + $0x28] sm:$0xff]  ;;  %v32_v28 = vld [vmem:[#allocation2 + $0x20] sm:$0xff]  ;;  %v31_v29 = vld [vmem:[#allocation2 + $0x18] sm:$0xff] }
  0x17   :  { %69 = vmatpush1.msra.mxu0 %v50_v10  ;;  %v30_v30 = vld [vmem:[#allocation2 + $0x10] sm:$0xff]  ;;  %v29_v31 = vld [vmem:[#allocation2 + $0x8] sm:$0xff]  ;;  %v28_v32 = vld [vmem:[#allocation2] sm:$0xff] }
  0x18   :  { %70 = vmatprep.subr.mxu0 %v49_v11  ;;  %v27_v33 = vld [vmem:[%s330_s0] sm:$0xff] }
  0x19   :  { %71 = vmatpush1.msra.mxu0 %v48_v12 }
  0x1a   :  { %72 = vmatprep.subr.mxu0 %v47_v13 }
  0x1b   :  { %73 = vmatpush1.msra.mxu0 %v46_v14 }
  0x1c   :  { %74 = vmatprep.subr.mxu0 %v45_v15 }
  0x1d   :  { %75 = vmatpush1.msra.mxu0 %v44_v16 }
  0x1e   :  { %76 = vmatprep.subr.mxu0 %v43_v17 }
  0x1f   :  { %77 = vmatpush1.msra.mxu0 %v42_v18 }
  0x20   :  { %78 = vmatprep.subr.mxu0 %v41_v19 }
  0x21   :  { %79 = vmatpush1.msra.mxu0 %v40_v20 }
  0x22   :  { %80 = vmatprep.subr.mxu0 %v39_v21 }
  0x23   :  { %81 = vmatpush1.msra.mxu0 %v38_v22 }
  0x24   :  { %82 = vmatprep.subr.mxu0 %v37_v23 }
  0x25   :  { %83 = vmatpush1.msra.mxu0 %v36_v24 }
  0x26   :  { %84 = vmatprep.subr.mxu0 %v35_v25 }
  0x27   :  { %85 = vmatpush1.msra.mxu0 %v34_v26 }
  0x28   :  { %86 = vmatprep.subr.mxu0 %v33_v27 }
  0x29   :  { %87 = vmatpush1.msra.mxu0 %v32_v28 }
  0x2a   :  { %88 = vmatprep.subr.mxu0 %v31_v29 }
  0x2b   :  { %89 = vmatpush1.msra.mxu0 %v30_v30 }
  0x2c   :  { %90 = vmatprep.subr.mxu0 %v29_v31 }
  0x2d   :  { %91 = vmatpush1.msra.mxu0 %v28_v32 }
  0x2e   :  { %125 = vmatmul.mubr.f32.vlgmr.msra.gmra.mxu0 %v27_v33 }
  0xee   :  { %v126_v35 = vpop.f32.mrf.mxu0 }
  0xef   :  { %131 = vst [vmem:[%s332_s2] sm:$0xff] %v126_v35  ;;  %v133_v38 = vmul.f32 %v126_v35, %v126_v35 }
  0xf0   :  { %v128_v37 = vpop.f32.mrf.mxu0 }
  0xf1   :  { %132 = vst [vmem:[%s332_s2 + $0x8] sm:$0xff] %v128_v37  ;;  %v134_v39 = vmul.f32 %v128_v37, %v128_v37  ;;  %v139_v37 = vshrl.u32 %v136_v34, 7 }
  0xf3   :  { %v135_v40 = vadd.f32 %v134_v39, %v133_v38  ;;  %vm233_vm14 = vcmp.lt.s32.totalorder %v139_v37, 1 }
  0xf5   :  { %v146_v41 = vsel %vm143_vm0, %v135_v40, -1.0 }
  0xf6   :  { %v150_v42 = vsel %vm147_vm1, 0.0, %v146_v41 }
  0xf7   :  { %151 = vmax.xlane.f32.xlu0 %v150_v42 }
 0x180   :  { %v152_v43 = vpop.xlane.xlu0 %151 }
 0x181   :  { %vm153_vm2 = vcmp.eq.f32.partialorder %v150_v42, %v152_v43 }
 0x182   :  { %v154_v44 = vsel %vm153_vm2, %v308_v36, 128 }
 0x183   :  { %v156_v45 = vshra.s32 %v154_v44, 16  ;;  %v155_v47 = vand.u32 65535, %v154_v44 }
 0x185   :  { %v158_v46 = vcvt.s32.f32 %v156_v45  ;;  %v157_v49 = vcvt.s32.f32 %v155_v47 }
 0x187   :  { %159 = vmin.xlane.f32.xlu0 %v158_v46 }
 0x210   :  { %v160_v48 = vpop.xlane.xlu0 %159 }
 0x211   :  { %vm161_vm3 = vcmp.eq.f32.partialorder %v158_v46, %v160_v48  ;;  %v166_v51 = vcvt.f32.s32 %v160_v48 }
 0x212   :  { %v162_v50 = vsel %vm161_vm3, %v157_v49, inf }
 0x213   :  { %163 = vmin.xlane.f32.xlu1 %v162_v50  ;;  %v167_v53 = vshll.u32 %v166_v51, 16 }
 0x29c   :  { %v164_v52 = vpop.xlane.xlu1 %163 }
 0x29d   :  { %v165_v54 = vcvt.f32.s32 %v164_v52 }
 0x29f   :  { %v168_v55 = vadd.s32 %v167_v53, %v165_v54 }
 0x2a1   :  { %vm169_vm4 = vcmp.eq.s32.totalorder %v308_v36, %v168_v55 }
 0x2a2   :  { %v170_v56 = vsel %vm169_vm4, -inf, %v150_v42 }
 0x2a3   :  { %171 = vmax.xlane.f32.xlu1 %v170_v56 }
 0x32c   :  { %v172_v57 = vpop.xlane.xlu1 %171 }
 0x32d   :  { %vm173_vm5 = vcmp.eq.f32.partialorder %v170_v56, %v172_v57 }
 0x32e   :  { %v174_v58 = vsel %vm173_vm5, %v308_v36, 128 }
 0x32f   :  { %v176_v59 = vshra.s32 %v174_v58, 16  ;;  %v175_v61 = vand.u32 65535, %v174_v58 }
 0x331   :  { %v178_v60 = vcvt.s32.f32 %v176_v59  ;;  %v177_v63 = vcvt.s32.f32 %v175_v61 }
 0x333   :  { %179 = vmin.xlane.f32.xlu0 %v178_v60 }
 0x3bc   :  { %v180_v62 = vpop.xlane.xlu0 %179 }
 0x3bd   :  { %vm181_vm6 = vcmp.eq.f32.partialorder %v178_v60, %v180_v62  ;;  %v186_v1 = vcvt.f32.s32 %v180_v62 }
 0x3be   :  { %v182_v0 = vsel %vm181_vm6, %v177_v63, inf }
 0x3bf   :  { %183 = vmin.xlane.f32.xlu1 %v182_v0  ;;  %v187_v3 = vshll.u32 %v186_v1, 16 }
 0x448   :  { %v184_v2 = vpop.xlane.xlu1 %183 }
 0x449   :  { %v185_v4 = vcvt.f32.s32 %v184_v2 }
 0x44b   :  { %v188_v5 = vadd.s32 %v187_v3, %v185_v4 }
 0x44d   :  { %vm189_vm7 = vcmp.eq.s32.totalorder %v308_v36, %v188_v5 }
 0x44e   :  { %v190_v6 = vsel %vm189_vm7, -inf, %v170_v56 }
 0x44f   :  { %191 = vmax.xlane.f32.xlu0 %v190_v6 }
 0x4d8   :  { %v192_v7 = vpop.xlane.xlu0 %191 }
 0x4d9   :  { %vm193_vm8 = vcmp.eq.f32.partialorder %v190_v6, %v192_v7 }
 0x4da   :  { %v194_v8 = vsel %vm193_vm8, %v308_v36, 128 }
 0x4db   :  { %v196_v9 = vshra.s32 %v194_v8, 16  ;;  %v195_v11 = vand.u32 65535, %v194_v8 }
 0x4dd   :  { %v198_v10 = vcvt.s32.f32 %v196_v9  ;;  %v197_v13 = vcvt.s32.f32 %v195_v11 }
 0x4df   :  { %199 = vmin.xlane.f32.xlu1 %v198_v10 }
 0x568   :  { %v200_v12 = vpop.xlane.xlu1 %199 }
 0x569   :  { %vm201_vm9 = vcmp.eq.f32.partialorder %v198_v10, %v200_v12  ;;  %v206_v15 = vcvt.f32.s32 %v200_v12 }
 0x56a   :  { %v202_v14 = vsel %vm201_vm9, %v197_v13, inf }
 0x56b   :  { %203 = vmin.xlane.f32.xlu0 %v202_v14  ;;  %v207_v17 = vshll.u32 %v206_v15, 16 }
 0x5f4   :  { %v204_v16 = vpop.xlane.xlu0 %203 }
 0x5f5   :  { %v205_v18 = vcvt.f32.s32 %v204_v16 }
 0x5f7   :  { %v208_v19 = vadd.s32 %v207_v17, %v205_v18 }
 0x5f9   :  { %vm209_vm10 = vcmp.eq.s32.totalorder %v308_v36, %v208_v19 }
 0x5fa   :  { %v210_v20 = vsel %vm209_vm10, -inf, %v190_v6 }
 0x5fb   :  { %211 = vmax.xlane.f32.xlu1 %v210_v20 }
 0x684   :  { %v212_v21 = vpop.xlane.xlu1 %211 }
 0x685   :  { %vm213_vm11 = vcmp.eq.f32.partialorder %v210_v20, %v212_v21 }
 0x686   :  { %v214_v22 = vsel %vm213_vm11, %v308_v36, 128 }
 0x687   :  { %v216_v23 = vshra.s32 %v214_v22, 16  ;;  %v215_v25 = vand.u32 65535, %v214_v22 }
 0x689   :  { %v218_v24 = vcvt.s32.f32 %v216_v23  ;;  %v217_v27 = vcvt.s32.f32 %v215_v25 }
 0x68b   :  { %219 = vmin.xlane.f32.xlu0 %v218_v24 }
 0x714   :  { %v220_v26 = vpop.xlane.xlu0 %219 }
 0x715   :  { %vm221_vm12 = vcmp.eq.f32.partialorder %v218_v24, %v220_v26  ;;  %v226_v29 = vcvt.f32.s32 %v220_v26 }
 0x716   :  { %v222_v28 = vsel %vm221_vm12, %v217_v27, inf }
 0x717   :  { %223 = vmin.xlane.f32.xlu1 %v222_v28  ;;  %v227_v31 = vshll.u32 %v226_v29, 16 }
 0x7a0   :  { %v224_v30 = vpop.xlane.xlu1 %223 }
 0x7a1   :  { %v225_v32 = vcvt.f32.s32 %v224_v30 }
 0x7a3   :  { %v228_v33 = vadd.s32 %v227_v31, %v225_v32 }
 0x7a5   :  { %vm229_vm13 = vcmp.eq.s32.totalorder %v308_v36, %v228_v33 }
 0x7a6   :  { %v230_v35 = vsel %vm229_vm13, -inf, %v210_v20 }
 0x7a7   :  { %231 = vmax.xlane.f32.xlu0 %v230_v35 }
 0x830   :  { %v232_v38 = vpop.xlane.xlu0 %231 }
 0x831   :  { %v234_v39 = vsel %vm233_vm14, %v232_v38, inf }
 0x832   :  { %v235_v40 = vrot.slane %v234_v39, 4 }
 0x834   :  { %v236_v41 = vmin.f32 %v234_v39, %v235_v40 }
 0x836   :  { %v237_v42 = vrot.slane %v236_v41, 2 }
 0x838   :  { %v238_v43 = vmin.f32 %v236_v41, %v237_v42 }
 0x83a   :  { %v239_v44 = vrot.slane %v238_v43, 1 }
 0x83c   :  { %v240_v45 = vmin.f32 %v238_v43, %v239_v44 }
 0x83e   :  { %241 = vst [vmem:[%s333_s3] sm:$0x1] %v240_v45 }
 0x83f   :  { %250 = vsyncpa [#allocation3], 1 }

</bundles_post_ra>
